<compile_context>
chip_gen: v6e
topology: v6e:2x2x1
jax: 0.10.0
libtpu: 0.0.40
codegen_flags: <defaults>
</compile_context>

<pallas_src>
import functools

import jax
import jax.numpy as jnp
from jax.experimental import pallas as pl
from jax.experimental.pallas import tpu as pltpu


# ----------------------------- tiling helper -----------------------------

def _pick_tile(dim, target, align):
    """Largest tile <= target that is a multiple of `align` and divides `dim`; else the full dim."""
    if dim <= target:
        return dim
    t = (target // align) * align
    while t >= align:
        if dim % t == 0:
            return t
        t -= align
    return dim


# ----------------------------- fused tiled linear -----------------------------
# y = act( rms_scale(x) * (x @ w) + b + pos ) + residual, all in one pallas_call.

def _fused_linear_kernel(*refs, act, rms_pre, has_pos, has_res, eps, inv_k):
    refs = list(refs)
    x_ref = refs.pop(0)
    w_ref = refs.pop(0)
    b_ref = refs.pop(0)
    pos_ref = refs.pop(0) if has_pos else None
    res_ref = refs.pop(0) if has_res else None
    o_ref = refs.pop(0)
    acc_ref = refs.pop(0)
    ssq_ref = refs.pop(0) if rms_pre else None

    k = pl.program_id(2)
    nk = pl.num_programs(2)

    @pl.when(k == 0)
    def _():
        acc_ref[...] = jnp.zeros_like(acc_ref)
        if rms_pre:
            ssq_ref[...] = jnp.zeros_like(ssq_ref)

    # bf16 MXU operands (no-op cast if inputs already bf16), f32 accumulation.
    x = x_ref[...].astype(jnp.bfloat16)
    acc_ref[...] += jnp.dot(x, w_ref[...].astype(jnp.bfloat16),
                            preferred_element_type=jnp.float32)
    if rms_pre:
        xf = x.astype(jnp.float32)
        ssq_ref[...] += jnp.sum(xf * xf, axis=-1, keepdims=True)

    @pl.when(k == nk - 1)
    def _():
        y = acc_ref[...]
        if rms_pre:
            # rmsnorm fused: rmsnorm(x) @ W == rsqrt(mean(x^2)+eps) * (x @ W) per row.
            # TODO(synk): valid only because simplermsnorm has no learned per-channel gain.
            y = y * jax.lax.rsqrt(ssq_ref[...] * inv_k + eps)
        y = y + b_ref[...].astype(jnp.float32)
        if has_pos:
            y = y + pos_ref[...].astype(jnp.float32)
        if act == "gelu":
            # TODO(synk): tanh approximation; PyTorch nn.GELU default is exact erf.
            y = jax.nn.gelu(y, approximate=True)
        elif act == "relu":
            y = jnp.maximum(y, 0.0)
        if has_res:
            y = y + res_ref[...].astype(jnp.float32)
        o_ref[...] = y.astype(o_ref.dtype)


def fused_linear(x2d, w, b, *, act="none", rms_pre=False, eps=1e-6,
                 residual=None, pos=None, tm=None, out_dtype=jnp.bfloat16):
    """Tiled + pipelined GEMM with fused pre-rmsnorm / bias / pos / activation / residual.

    x2d: (M, K) bf16, w: (K, N) bf16, b: (N,) f32, pos: (Np, N) with Np | M, residual: (M, N).
    K is the trailing 'arbitrary' reduction axis; f32 VMEM accumulator.
    """
    M, K = x2d.shape
    N = w.shape[1]
    if tm is None:
        tm = _pick_tile(M, 512, 16)      # 16-aligned for bf16 sublane packing
    tn = _pick_tile(N, 512, 128)
    tk = _pick_tile(K, 1024, 128)
    grid = (M // tm, N // tn, K // tk)

    in_specs = [
        pl.BlockSpec((tm, tk), lambda i, j, k: (i, k)),
        pl.BlockSpec((tk, tn), lambda i, j, k: (k, j)),
        pl.BlockSpec((1, tn), lambda i, j, k: (0, j)),
    ]
    inputs = [x2d, w, b.reshape(1, N)]
    if pos is not None:
        npos = pos.shape[0] // tm
        if npos <= 1:
            pos_map = lambda i, j, k: (0, j)
        else:
            pos_map = lambda i, j, k, _np=npos: (i % _np, j)
        in_specs.append(pl.BlockSpec((tm, tn), pos_map))
        inputs.append(pos)
    if residual is not None:
        in_specs.append(pl.BlockSpec((tm, tn), lambda i, j, k: (i, j)))
        inputs.append(residual)

    scratch = [pltpu.VMEM((tm, tn), jnp.float32)]
    if rms_pre:
        scratch.append(pltpu.VMEM((tm, 1), jnp.float32))

    cost = pl.CostEstimate(
        flops=2 * M * K * N,
        transcendentals=M * N if act == "gelu" else 0,
        bytes_accessed=2 * (M * K + K * N + M * N),
    )

    kernel = functools.partial(
        _fused_linear_kernel, act=act, rms_pre=rms_pre,
        has_pos=pos is not None, has_res=residual is not None,
        eps=eps, inv_k=1.0 / K)

    return pl.pallas_call(
        kernel,
        out_shape=jax.ShapeDtypeStruct((M, N), out_dtype),
        grid=grid,
        in_specs=in_specs,
        out_specs=pl.BlockSpec((tm, tn), lambda i, j, k: (i, j)),
        scratch_shapes=scratch,
        compiler_params=pltpu.CompilerParams(
            dimension_semantics=("parallel", "parallel", "arbitrary"),
            # Headroom under v7x's 64 MiB VMEM; also valid on v5e/v6e (128 MiB).
            vmem_limit_bytes=44 * 1024 * 1024),
        cost_estimate=cost,
    )(*inputs)


# ----------------------------- attention (lane-dense qkv, bf16 MXU) -----------------------------

def _attn_kernel(qkv_ref, o_ref, *, num_heads, scale):
    qkv = qkv_ref[0]                               # (N, 3*D) bf16, lane-dense
    n, three_d = qkv.shape
    d = three_d // 3
    dh = d // num_heads
    outs = []
    # TODO(synk): for long sequences / many heads replace with a flash-style KV-tiled
    # online softmax with a q-tile grid axis (bounds the (N, N) score block on v7x 64 MiB VMEM).
    for h in range(num_heads):
        q = qkv[:, h * dh:(h + 1) * dh].astype(jnp.bfloat16)
        k = qkv[:, d + h * dh: d + (h + 1) * dh].astype(jnp.bfloat16)
        v = qkv[:, 2 * d + h * dh: 2 * d + (h + 1) * dh].astype(jnp.bfloat16)
        # q @ k^T without an explicit transpose; bf16 operands, f32 accumulation.
        s = jax.lax.dot_general(q, k, (((1,), (1,)), ((), ())),
                                preferred_element_type=jnp.float32) * scale
        m = jnp.max(s, axis=-1, keepdims=True)
        p = jnp.exp(s - m)
        l = jnp.sum(p, axis=-1, keepdims=True)
        p = p * pl.reciprocal(l, approx=True)
        outs.append(jnp.dot(p.astype(jnp.bfloat16), v,
                            preferred_element_type=jnp.float32))   # (N, dh)
    # Single lane-dense (N, D) store (no per-head narrow masked stores).
    o_ref[0] = jnp.concatenate(outs, axis=-1).astype(o_ref.dtype)


def attention(qkv_b_n_3d, num_heads, scale):
    """qkv: (B, N, 3*D) lane-dense bf16 -> (B, N, D) bf16. One grid step per batch element."""
    B, N, three_d = qkv_b_n_3d.shape
    D = three_d // 3
    return pl.pallas_call(
        functools.partial(_attn_kernel, num_heads=num_heads, scale=scale),
        out_shape=jax.ShapeDtypeStruct((B, N, D), qkv_b_n_3d.dtype),
        grid=(B,),
        in_specs=[pl.BlockSpec((1, N, three_d), lambda b: (b, 0, 0))],
        out_specs=pl.BlockSpec((1, N, D), lambda b: (b, 0, 0)),
        compiler_params=pltpu.CompilerParams(dimension_semantics=("parallel",)),
    )(qkv_b_n_3d)


# ----------------------------- fused epilogue: mean -> rmsnorm -> classifier -----------------------------

def _head_kernel(x_ref, w_ref, b_ref, o_ref, *, eps, inv_n):
    x = x_ref[...].astype(jnp.float32)             # (tb, N, D)
    pooled = jnp.sum(x, axis=1) * inv_n            # token mean -> (tb, D)
    ms = jnp.mean(pooled * pooled, axis=-1, keepdims=True)
    pooled = pooled * jax.lax.rsqrt(ms + eps)      # simplermsnorm
    y = jnp.dot(pooled, w_ref[...], preferred_element_type=jnp.float32)
    y = y + b_ref[...]
    o_ref[...] = y.astype(o_ref.dtype)


def head_forward(tok, w_head, b_head, eps=1e-6):
    B, N, D = tok.shape
    C = w_head.shape[1]
    tb = _pick_tile(B, 8, 8) if B > 8 else B
    return pl.pallas_call(
        functools.partial(_head_kernel, eps=eps, inv_n=1.0 / N),
        out_shape=jax.ShapeDtypeStruct((B, C), jnp.float32),
        grid=(B // tb,),
        in_specs=[
            pl.BlockSpec((tb, N, D), lambda i: (i, 0, 0)),
            pl.BlockSpec((D, C), lambda i: (0, 0)),
            pl.BlockSpec((1, C), lambda i: (0, 0)),
        ],
        out_specs=pl.BlockSpec((tb, C), lambda i: (i, 0)),
        compiler_params=pltpu.CompilerParams(dimension_semantics=("parallel",)),
    )(tok, w_head, b_head.reshape(1, C))


# ----------------------------- Model (glue + params) -----------------------------

def init_params(key, *, channels, patch_size, image_size, dim, depth, num_heads,
                mlp_dim, num_classes):
    patch_dim = channels * patch_size * patch_size
    num_row_patches = image_size // patch_size
    num_patches = num_row_patches * num_row_patches

    def nrm(k, shape, scale=0.02):
        return (scale * jax.random.normal(k, shape)).astype(jnp.float32)

    keys = jax.random.split(key, 4 + depth)
    params = {
        "patch_size": patch_size,
        "num_heads": num_heads,
        # GEMM weights stored in bf16 (stream bf16 operands, f32 accumulation).
        "w_patch": nrm(keys[0], (patch_dim, dim)).astype(jnp.bfloat16),
        "b_patch": jnp.zeros((dim,), jnp.float32),
        # torch.randn(1, num_patches + 1, dim)
        "pos_embedding": jax.random.normal(keys[1], (1, num_patches + 1, dim)).astype(jnp.float32),
        "w_head": nrm(keys[2], (dim, num_classes)),
        "b_head": jnp.zeros((num_classes,), jnp.float32),
        "layers": [],
    }
    for i in range(depth):
        lk = jax.random.split(keys[4 + i], 4)
        params["layers"].append({
            "w_qkv": nrm(lk[0], (dim, 3 * dim)).astype(jnp.bfloat16),
            "b_qkv": jnp.zeros((3 * dim,), jnp.float32),
            "w_proj": nrm(lk[1], (dim, dim)).astype(jnp.bfloat16),
            "b_proj": jnp.zeros((dim,), jnp.float32),
            "w_fc1": nrm(lk[2], (dim, mlp_dim)).astype(jnp.bfloat16),
            "b_fc1": jnp.zeros((mlp_dim,), jnp.float32),
            "w_fc2": nrm(lk[3], (mlp_dim, dim)).astype(jnp.bfloat16),
            "b_fc2": jnp.zeros((dim,), jnp.float32),
        })
    return params


def block_forward(lp, x2d, B, N, D, num_heads):
    dh = D // num_heads
    # --- attention sub-block (pre-norm); rmsnorm fused into qkv GEMM, residual into proj GEMM ---
    qkv = fused_linear(x2d, lp["w_qkv"], lp["b_qkv"], rms_pre=True)        # (B*N, 3D) bf16
    attn = attention(qkv.reshape(B, N, 3 * D), num_heads, float(dh) ** -0.5)
    x2d = fused_linear(attn.reshape(B * N, D), lp["w_proj"], lp["b_proj"], residual=x2d)
    # --- MLP sub-block (pre-norm); rmsnorm + gelu fused into fc1, residual into fc2 ---
    h = fused_linear(x2d, lp["w_fc1"], lp["b_fc1"], rms_pre=True, act="gelu")
    x2d = fused_linear(h, lp["w_fc2"], lp["b_fc2"], residual=x2d)
    return x2d


def vin_forward(params, x):
    """x: (B, C, H, W) NCHW float32 -> logits (B, num_classes) float32."""
    B, C, H, W = x.shape
    p = params["patch_size"]
    hh, ww = H // p, W // p
    # einops: 'b c (h p1) (w p2) -> b (h w) (p1 p2 c)'  (data-layout plumbing, left to XLA)
    xr = x.reshape(B, C, hh, p, ww, p)
    xr = jnp.transpose(xr, (0, 2, 4, 3, 5, 1))
    N = hh * ww
    D = params["w_patch"].shape[1]
    patches = xr.reshape(B * N, p * p * C).astype(jnp.bfloat16)

    # use_pos=True; dropout identity at eval.  Pos add fused into the patch-GEMM epilogue
    # (pos block index = row-block mod (N / tm)) when the layout allows it.
    pos2d = params["pos_embedding"][0, :N]                                 # (N, D) f32
    if N % 16 == 0:
        tm_pos = _pick_tile(N, 512, 16)                                    # divides N (and B*N)
        tok = fused_linear(patches, params["w_patch"], params["b_patch"],
                           pos=pos2d, tm=tm_pos)                           # (B*N, D) bf16
    else:
        tok = fused_linear(patches, params["w_patch"], params["b_patch"])
        tok = (tok.reshape(B, N, D) + pos2d[None].astype(tok.dtype)).reshape(B * N, D)

    for lp in params["layers"]:
        tok = block_forward(lp, tok, B, N, D, params["num_heads"])

    # head = token mean -> simplermsnorm -> linear, fused in one kernel
    logits = head_forward(tok.reshape(B, N, D), params["w_head"], params["b_head"])
    return logits


if __name__ == "__main__":
    # Small, forward-consistent shapes.
    B, C, IMG = 2, 3, 16
    patch_size, dim, depth, num_heads, mlp_dim, num_classes = 4, 32, 2, 2, 64, 10

    key = jax.random.PRNGKey(0)
    pkey, xkey = jax.random.split(key)
    params = init_params(pkey, channels=C, patch_size=patch_size, image_size=IMG,
                         dim=dim, depth=depth, num_heads=num_heads,
                         mlp_dim=mlp_dim, num_classes=num_classes)
    x = jax.random.normal(xkey, (B, C, IMG, IMG), dtype=jnp.float32)

    logits = vin_forward(params, x)
    jax.block_until_ready(logits)
    assert logits.shape == (B, num_classes)
    assert bool(jnp.all(jnp.isfinite(logits)))
    print("KERNEL_OK")
</pallas_src>

<mosaic_0001>
module attributes {stable_mosaic.version = 11 : i64} {
  func.func @_fused_linear_kernel(%arg0: i32, %arg1: i32, %arg2: i32, %arg3: memref<16x48xbf16, #tpu.memory_space<vmem>>, %arg4: memref<48x32xbf16, #tpu.memory_space<vmem>>, %arg5: memref<1x32xf32, #tpu.memory_space<vmem>>, %arg6: memref<16x32xf32, #tpu.memory_space<vmem>>, %arg7: memref<16x32xbf16, #tpu.memory_space<vmem>>, %arg8: memref<16x32xf32, #tpu.memory_space<vmem>>) attributes {dimension_semantics = [#tpu.dimension_semantics<parallel>, #tpu.dimension_semantics<parallel>, #tpu.dimension_semantics<arbitrary>], iteration_bounds = array<i64: 2, 1, 1>, scalar_prefetch = 0 : i64, scratch_operands = 1 : i64, tpu.core_type = #tpu.core_type<tc>, window_params = [{transform_indices = @transform_0, window_bounds = array<i64: 16, 48>}, {transform_indices = @transform_1, window_bounds = array<i64: 48, 32>}, {transform_indices = @transform_2, window_bounds = array<i64: 1, 32>}, {transform_indices = @transform_3, window_bounds = array<i64: 16, 32>}, {transform_indices = @transform_4, window_bounds = array<i64: 16, 32>}]} {
    %c0_i32 = arith.constant 0 : i32
    %0 = arith.cmpi eq, %arg2, %c0_i32 : i32
    %1 = arith.extui %0 : i1 to i32
    %c0_i32_0 = arith.constant 0 : i32
    %2 = arith.cmpi ne, %1, %c0_i32_0 : i32
    scf.if %2 {
      %cst_10 = arith.constant 0.000000e+00 : f32
      %12 = vector.broadcast %cst_10 : f32 to vector<16x32xf32>
      %c0_11 = arith.constant 0 : index
      %c0_12 = arith.constant 0 : index
      %13 = vector.load %arg8[%c0_11, %c0_12] : memref<16x32xf32, #tpu.memory_space<vmem>>, vector<16x32xf32>
      tpu.vector_store %arg8[%c0_11, %c0_12], %12 {strides = array<i32>} : memref<16x32xf32, #tpu.memory_space<vmem>>, vector<16x32xf32>,
    } else {
    }
    %c0 = arith.constant 0 : index
    %c0_1 = arith.constant 0 : index
    %3 = vector.load %arg3[%c0, %c0_1] : memref<16x48xbf16, #tpu.memory_space<vmem>>, vector<16x48xbf16>
    %c0_2 = arith.constant 0 : index
    %c0_3 = arith.constant 0 : index
    %4 = vector.load %arg8[%c0_2, %c0_3] : memref<16x32xf32, #tpu.memory_space<vmem>>, vector<16x32xf32>
    %c0_4 = arith.constant 0 : index
    %c0_5 = arith.constant 0 : index
    %5 = vector.load %arg4[%c0_4, %c0_5] : memref<48x32xbf16, #tpu.memory_space<vmem>>, vector<48x32xbf16>
    %cst = arith.constant dense<0.000000e+00> : vector<16x32xf32>
    %6 = tpu.matmul %3, %5, %cst {dimension_numbers = #tpu.dot_dimension_numbers<[1], [0], [0], [1], [0, 0, 1, 1], [], []>} : vector<16x48xbf16>, vector<48x32xbf16>, vector<16x32xf32> -> vector<16x32xf32>
    %7 = arith.addf %4, %6 : vector<16x32xf32>
    %c0_6 = arith.constant 0 : index
    %c0_7 = arith.constant 0 : index
    %8 = vector.load %arg8[%c0_6, %c0_7] : memref<16x32xf32, #tpu.memory_space<vmem>>, vector<16x32xf32>
    tpu.vector_store %arg8[%c0_6, %c0_7], %7 {strides = array<i32>} : memref<16x32xf32, #tpu.memory_space<vmem>>, vector<16x32xf32>,
    %c0_i32_8 = arith.constant 0 : i32
    %9 = arith.cmpi eq, %arg2, %c0_i32_8 : i32
    %10 = arith.extui %9 : i1 to i32
    %c0_i32_9 = arith.constant 0 : i32
    %11 = arith.cmpi ne, %10, %c0_i32_9 : i32
    scf.if %11 {
      %c0_10 = arith.constant 0 : index
      %c0_11 = arith.constant 0 : index
      %12 = vector.load %arg8[%c0_10, %c0_11] : memref<16x32xf32, #tpu.memory_space<vmem>>, vector<16x32xf32>
      %c0_12 = arith.constant 0 : index
      %c0_13 = arith.constant 0 : index
      %13 = vector.load %arg5[%c0_12, %c0_13] : memref<1x32xf32, #tpu.memory_space<vmem>>, vector<1x32xf32>
      %14 = vector.broadcast %13 : vector<1x32xf32> to vector<16x32xf32>
      %15 = arith.addf %12, %14 : vector<16x32xf32>
      %c0_14 = arith.constant 0 : index
      %c0_15 = arith.constant 0 : index
      %16 = vector.load %arg6[%c0_14, %c0_15] : memref<16x32xf32, #tpu.memory_space<vmem>>, vector<16x32xf32>
      %17 = arith.addf %15, %16 : vector<16x32xf32>
      %18 = arith.truncf %17 : vector<16x32xf32> to vector<16x32xbf16>
      %c0_16 = arith.constant 0 : index
      %c0_17 = arith.constant 0 : index
      %19 = vector.load %arg7[%c0_16, %c0_17] : memref<16x32xbf16, #tpu.memory_space<vmem>>, vector<16x32xbf16>
      tpu.vector_store %arg7[%c0_16, %c0_17], %18 {strides = array<i32>} : memref<16x32xbf16, #tpu.memory_space<vmem>>, vector<16x32xbf16>,
    } else {
    }
    return
  }
  func.func @transform_0(%arg0: i32, %arg1: i32, %arg2: i32) -> (i32, i32) {
    %c0_i32 = arith.constant 0 : i32
    return %arg0, %arg2 : i32, i32
  }
  func.func @transform_1(%arg0: i32, %arg1: i32, %arg2: i32) -> (i32, i32) {
    %c0_i32 = arith.constant 0 : i32
    return %arg2, %arg1 : i32, i32
  }
  func.func @transform_2(%arg0: i32, %arg1: i32, %arg2: i32) -> (i32, i32) {
    %c0_i32 = arith.constant 0 : i32
    %c0_i32_0 = arith.constant 0 : i32
    return %c0_i32, %arg1 : i32, i32
  }
  func.func @transform_3(%arg0: i32, %arg1: i32, %arg2: i32) -> (i32, i32) {
    %c0_i32 = arith.constant 0 : i32
    %c0_i32_0 = arith.constant 0 : i32
    return %c0_i32, %arg1 : i32, i32
  }
  func.func @transform_4(%arg0: i32, %arg1: i32, %arg2: i32) -> (i32, i32) {
    %c0_i32 = arith.constant 0 : i32
    return %arg0, %arg1 : i32, i32
  }
}

</mosaic_0001>

<bundles_post_ra>
// kernel: tpu_custom_call.1
= control target key start
LH: loop header
LB: loop body
LE: loop exit
PB: predicated region body
PF: predicated region fallthrough
CT: control target
= control target key end

     0   :  { %9 = vsyncpa [#allocation4], 0  ;;  %s900_s0 = inlined_call_operand.vmem [shape: bf16[32,48], index: 0, kind: input, shape index: {}]   ;;  %s901_s1 = inlined_call_operand.vmem [shape: bf16[48,32], index: 1, kind: input, shape index: {}]   ;;  %s902_s2 = inlined_call_operand.vmem [shape: f32[1,32], index: 2, kind: input, shape index: {}]   ;;  %s903_s3 = inlined_call_operand.vmem [shape: f32[16,32], index: 3, kind: input, shape index: {}]   ;;  %s904_s4 = inlined_call_operand.hbm [shape: bf16[32,32], index: 4, kind: output, shape index: {}]  }
   0x1   :  { %11 = vsyncpa [#allocation4 + $0x1], 0  ;;  %s765_s15 = smov 0   ;;  %s767_s16 = smov 0  }
   0x2   :  { %s769_s17 = smov 0   ;;  %s771_s18 = smov 0  }
   0x3   :  { %s773_s19 = smov 0   ;;  %s775_s20 = smov 0  }
   0x4 LB: > { %s553_s21 = sadd.s32 4294967295, %s733_s20   ;;  %s554_s22 = sadd.s32 4294967294, %s733_s20   ;;  %s733_s20 = sphi %s775_s20, %s17_s20   ;;  %s729_s19 = sphi %s773_s19, %s911_s19   ;;  %s725_s18 = sphi %s771_s18, %s910_s18   ;;  %s721_s17 = sphi %s769_s17, %s909_s17   ;;  %s717_s16 = sphi %s767_s16, %s908_s16   ;;  %s713_s15 = sphi %s765_s15, %s907_s15  }
   0x5   : > { %s36_s23 = sadd.s32 1, %s729_s19  ;;  %s153_s24 = sadd.s32 1, %s721_s17 }
   0x6   : > { %p38_p0 = scmp.ge.s32.totalorder %s36_s23, 2  ;;  %p163_p1 = scmp.ne.s32.totalorder %s721_s17, %s717_s16 }
   0x7   : > { %p164_p2 = scmp.eq.s32.totalorder %s553_s21, 1  ;;  %p169_p3 = scmp.ne.s32.totalorder %s717_s16, %s713_s15 }
   0x8   : > { %s913_s23 = smov (%p38_p0, %s36_s23), 0  ;;  %p170_p5 = scmp.eq.s32.totalorder %s554_s22, 1 }
   0x9   : > { %p805_p4 = por %p164_p2, %p163_p1  ;;  %s148_s26 = ssub.s32 %s729_s19, %s913_s23 }
   0xa   : > { %p560_p6 = scmp.ge.s32.totalorder %s733_s20, 1  ;;  %p151_p7 = scmp.eq.s32.totalorder %s148_s26, 0 }
   0xb   : > { %p812_p8 = por %p170_p5, %p169_p3  ;;  %p225_p9 = scmp.lt.s32.totalorder %s733_s20, 3 }
   0xc   : > { %s818_s28 = scalar_select %p151_p7, %s721_s17, %s153_s24  }
   0xd   : > { %p226_p10 = pnand %p560_p6, %p225_p9 }
   0xe   : > { %s562_s7 = sshll.u32 (!%p226_p10), %s725_s18, 1  ;;  %s266_s14 = sand.u32 (!%p226_p10), 1, %s717_s16  }
   0xf   : > { %229 = sbr.rel (%p226_p10) target bundleno = 260 (0x104), region = 36  ;;  %p270_p11 = scmp.lt.s32.totalorder (!%p226_p10), %s562_s7, 3 }
  0x10   : > { %s561_s29 = sshll.u32 (!%p226_p10), %s266_s14, 3  ;;  %s579_s6 = sshll.u32 (!%p226_p10), %s725_s18, 7 }
  0x11   : > { %s851_s11 = scalar_lea.hbm (!%p226_p10), %s904_s4, %s579_s6  ;;  %s855_s12 = scalar_lea.sflag (!%p226_p10), [#allocation4], %s266_s14 }
  0x12   : > { %s737_s18 = smov (!%p226_p10), [#allocation3]  }
  0x13   : > { %s661_s21 = sshll.u32 (!%p226_p10), %s737_s18, 4  ;;  %s662_s21 = int_to_ptr.vmem [resolvable:$false] %s661_s21 }
  0x14   : > { %v653_v0 = vld [vmem:[%s901_s1 + $0x10] sm:$0xff]   ;;  %v735_v1 = vmov 0.0   ;;  %v654_v2 = vld [vmem:[%s901_s1 + $0x8] sm:$0xff]   ;;  %vm736_vm0 = vmmov 0   ;;  %vm300_vm1 = vcmask 261120   ;;  %s915_s7 = smov (!%p270_p11, %s562_s7), 3 }
  0x15   : > { %584 = vmatprep.subr.bf16.mxu0 %v735_v1  ;;  %590 = vmatprep.mubr.msk.bf16.mxu0 %vm736_vm0, %v735_v1  ;;  %301 = vst.msk [vmem:[#allocation2] sm:$0xff] %vm300_vm1, %v735_v1  ;;  %302 = vst.msk [vmem:[#allocation2 + $0x8] sm:$0xff] %vm300_vm1, %v735_v1  ;;  %v655_v3 = vld [vmem:[%s901_s1] sm:$0xff]   ;;  %s563_s10 = sshll.u32 %s915_s7, 2  ;;  %vm336_vm2 = vcmask 392192   ;;  %v401_v19 = vld [vmem:[%s903_s3 + $0x8] sm:$0xff] }
  0x16   : > { %585 = vmatpush3.bf16.msra.mxu0 %v653_v0  ;;  %s276_s13 = scalar_lea.vmem %s900_s0, %s563_s10  ;;  %v569_v13 = vld [vmem:[%s902_s2] ss:$0 sm:$0xff]  ;;  %vm412_vm3 = vcmask 257024   ;;  %s268_s7 = scalar_lea.vmem [#allocation3], %s561_s29 }
  0x17   : > { %586 = vmatprep.subr.bf16.mxu0 %v735_v1  ;;  %v656_v4 = vld [vmem:[%s276_s13] sm:$0xff]   ;;  %s430_s8 = sshll.u32 %s268_s7, 4  ;;  %s663_s22 = scalar_lea.vmem %s662_s21, 256  ;;  %s853_s8 = int_to_ptr.vmem [resolvable:$true] %s430_s8 }
  0x18   : > { %v400_v15 = vld [vmem:[%s903_s3] sm:$0xff]  ;;  %s657_s13 = scalar_lea.vmem %s853_s8, 128  ;;  %p664_p1 = scmp.lt.s32.totalorder %s853_s8, %s662_s21 }
  0x19   : > { %p658_p12 = scmp.ne.s32.totalorder %s853_s8, %s657_s13  ;;  %p665_p2 = scmp.lt.s32.totalorder %s663_s22, %s657_s13 }
  0x1a   : > { %587 = vmatpush3.bf16.msra.mxu0 %v654_v2 }
  0x1b   : > { %588 = vmatprep.subr.bf16.mxu0 %v735_v1  ;;  %p659_p13 = pnand %p658_p12, %p805_p4  ;;  %p666_p3 = por %p665_p2, %p664_p1 }
  0x1c   : > { %v305_v5 = vld [vmem:[#allocation2] sm:$0xff]  ;;  %v306_v9 = vld [vmem:[#allocation2 + $0x8] sm:$0xff] }
  0x1d   : > { %p660_p0 = pneg %p659_p13 }
  0x1e   : > { %589 = vmatpush3.bf16.msra.mxu0 %v655_v3 }
  0x1f   : > { %p667_p5 = pnand %p666_p3, %p660_p0 }
  0x21   : > { %591 = vmatmul.mubr.msk.bf16.vlgmr.msra.gmra.mxu0 %vm336_vm2, %v656_v4 }
  0xe1   : > { %v374_v6 = vpop.f32.mrf.mxu0 }
  0xe2   : > { %v381_v7 = vadd.f32 %v374_v6, %v305_v5 }
  0xe3   : > { %v592_v8 = vpop.f32.mrf.mxu0 }
  0xe4   : > { %384 = vst.msk [vmem:[#allocation2] sm:$0xff] %vm300_vm1, %v381_v7 }
  0xe5   : > { %v377_v10 = vpop.f32.mrf.mxu0 }
  0xe6   : > { %v382_v11 = vadd.f32 %v377_v10, %v306_v9 }
  0xe7   : > { %v593_v12 = vpop.f32.mrf.mxu0 }
  0xe8   : > { %385 = vst.msk [vmem:[#allocation2 + $0x8] sm:$0xff] %vm300_vm1, %v382_v11 }
  0xeb   : > { %v389_v14 = vld [vmem:[#allocation2] sm:$0xff] }
  0xec   : > { %v398_v16 = vadd.f32 %v569_v13, %v389_v14 }
  0xee   : > { %v402_v17 = vadd.f32 %v400_v15, %v398_v16 }
  0xef   : > { %v390_v18 = vld [vmem:[#allocation2 + $0x8] sm:$0xff] }
  0xf0   : > { %v399_v20 = vadd.f32 %v569_v13, %v390_v18  ;;  %v577_v21 = vpack.c.bf16 %v402_v17, %v402_v17 }
  0xf2   : > { %v403_v22 = vadd.f32 %v401_v19, %v399_v20  ;;  %413 = vst.msk [vmem:[%s268_s7] sm:$0xf] %vm412_vm3, %v577_v21 }
  0xf4   : > { %v578_v23 = vpack.c.bf16 %v403_v22, %v403_v22 }
  0xf6   : > { %414 = vst.msk [vmem:[%s268_s7 + $0x4] sm:$0xf] %vm412_vm3, %v578_v23 }
  0xf7   : > { %670 = shalt.err (!%p667_p5)
}
  0xf8   : > { %s671_s14 = scalar_lea.hbm %s851_s11, 128  ;;  %s675_s29 = scalar_lea.hbm %s904_s4, 256 }
  0xf9   : > { %p672_p6 = scmp.ne.s32.totalorder %s851_s11, %s671_s14  ;;  %p676_p10 = scmp.lt.s32.totalorder %s851_s11, %s904_s4 }
  0xfa   : > { %p677_p11 = scmp.lt.s32.totalorder %s675_s29, %s671_s14 }
  0xfb   : > { %p673_p7 = pnand %p672_p6, %p805_p4 }
  0xfc   : > { %p678_p12 = por %p677_p11, %p676_p10 }
  0xfd   : > { %p674_p9 = pneg %p673_p7 }
  0xff   : > { %p679_p13 = pnand %p678_p12, %p674_p9 }
 0x101   : > { %682 = shalt.err (!%p679_p13)
}
 0x102   : > { %s738_s6 = smov 64   ;;  %s739_s7 = smov 4  }
 0x103   : > { %594 = dma.vmem_to_hbm [thread:$0]  (%p805_p4), %s853_s8, 128, %s851_s11, %s855_s12, %s738_s6, %s738_s6, %s739_s7  }
 0x104 PF: > { %p600_p0 = scmp.ge.s32.totalorder %s733_s20, 2  ;;  %s445_s9 = sand.u32 1, %s713_s15  }
 0x105   : > { %s446_s10 = scalar_lea.sflag [#allocation4], %s445_s9 }
 0x106   : > { %p597_p1 = pnand %p600_p0, %p812_p8 }
 0x108   : > { %p598_p2 = pneg %p597_p1 }
 0x10a   : > { %708 = dma.done.wait (%p598_p2), %s446_s10, 128  }
 0x10b   : > { %710 = vsyncadd (%p598_p2), %s446_s10, 4294967168  ;;  %s17_s20 = sadd.s32 1, %s733_s20   ;;  %s907_s15 = smov %s717_s16 }
 0x10c   : > { %p14_p3 = scmp.ge.s32.totalorder %s17_s20, 4   ;;  %s908_s16 = smov %s721_s17 }
 0x10d   : > { %s909_s17 = smov %s818_s28  ;;  %s910_s18 = smov %s729_s19 }
 0x10e   : > { %s911_s19 = smov %s913_s23  ;;  %16 = sbr.rel (!%p14_p3) target bundleno = 4 (0x4), region = 88 }
 0x113   :  { %451 = vsyncpa [#allocation4], 1 }
 0x114   :  { %453 = vsyncpa [#allocation4 + $0x1], 1 }

</bundles_post_ra>
